<compile_context>
chip_gen: v6e
topology: v6e:2x2x1
jax: 0.10.0
libtpu: 0.0.40
codegen_flags: <defaults>
</compile_context>

<pallas_src>
import jax
import jax.numpy as jnp
from jax.experimental import pallas as pl
from jax.experimental.pallas import tpu as pltpu


def _round_up(n, m):
    return ((n + m - 1) // m) * m


def mlp_kernel(x_ref, w1_ref, b1_ref, w2_ref, b2_ref, w3_ref, b3_ref, o_ref):
    # x_ref: (10, TILE_B) feature-major, lane-dense batch tile.
    x = x_ref[...]

    h1 = jnp.dot(w1_ref[...], x, preferred_element_type=jnp.float32) + b1_ref[...]
    h1 = jnp.maximum(h1, 0.0)                      # ReLU, (6, TILE_B)

    h2 = jnp.dot(w2_ref[...], h1, preferred_element_type=jnp.float32) + b2_ref[...]
    h2 = jnp.maximum(h2, 0.0)                      # ReLU, (4, TILE_B)

    h3 = jnp.dot(w3_ref[...], h2, preferred_element_type=jnp.float32) + b3_ref[...]
    o_ref[...] = jax.nn.sigmoid(h3)                # Sigmoid, (1, TILE_B)


def _choose_tile_b(Bp, target_tile_b):
    """Lane tile (multiple of 128) that is large enough to hide the ~0.35 us
    per-grid-step overhead, yet leaves >= 4 grid steps when the batch allows
    so v7x's two TensorCores each get >= 2 double-buffered steps."""
    tile = _round_up(min(target_tile_b, Bp), 128)
    n_steps = pl.cdiv(Bp, tile)
    if n_steps < 4 and Bp >= 4 * 128:
        tile = _round_up(pl.cdiv(Bp, 4), 128)
    return min(tile, Bp)


def mlp_forward_fm(x_fm, params, *, target_tile_b=65536):
    """Fast path.  x_fm: feature-major (10, B) float32.  Returns (1, B).

    Feature-major is the HBM/VMEM-friendly orientation (batch on the 128-wide
    lane axis); produce data in this layout upstream to avoid any relayout.
    """
    w1, b1, w2, b2, w3, b3 = params  # w: (out, in), b: (out, 1)
    F, B = x_fm.shape
    assert F == 10

    # Pad only to a lane multiple (128), never up to tile_b.
    Bp = _round_up(B, 128)
    if Bp != B:
        x_fm = jnp.pad(x_fm, ((0, 0), (0, Bp - B)))

    tile_b = _choose_tile_b(Bp, target_tile_b)
    grid = (pl.cdiv(Bp, tile_b),)   # partial last tile handled by Pallas masking

    const = lambda a: pl.BlockSpec(a.shape, lambda i: (0, 0))

    out_fm = pl.pallas_call(
        mlp_kernel,
        out_shape=jax.ShapeDtypeStruct((1, Bp), jnp.float32),
        grid_spec=pltpu.PrefetchScalarGridSpec(
            num_scalar_prefetch=0,
            grid=grid,
            in_specs=[
                pl.BlockSpec((10, tile_b), lambda i: (0, i)),   # streaming x
                const(w1), const(b1),
                const(w2), const(b2),
                const(w3), const(b3),
            ],
            out_specs=pl.BlockSpec((1, tile_b), lambda i: (0, i)),
        ),
        compiler_params=pltpu.CompilerParams(
            # v7x: split batch tiles across the 2 TensorCores (no-op elsewhere).
            dimension_semantics=("parallel",),
            # 64K-lane tiles need ~25 MiB; 32 MiB is safe on v5e/v6e/v7x.
            vmem_limit_bytes=32 * 1024 * 1024,
        ),
        cost_estimate=pl.CostEstimate(
            flops=176 * Bp,           # 2*(10*6 + 6*4 + 4*1) per batch element
            transcendentals=Bp,       # sigmoid
            bytes_accessed=44 * Bp,   # 40 B in + 4 B out per batch element
        ),
    )(x_fm, w1, b1, w2, b2, w3, b3)

    return out_fm[:, :B]


def mlp_forward(x, params, *, target_tile_b=65536):
    """PyTorch-contract path: x is (B, 10) batch-major; returns (B, 1).

    Does a single fused relayout to feature-major; for best end-to-end
    throughput call mlp_forward_fm with (10, B) data directly."""
    B = x.shape[0]
    out_fm = mlp_forward_fm(x.T, params, target_tile_b=target_tile_b)
    # Metadata-only reshape (no HBM relayout) instead of another transpose.
    return out_fm[0, :].reshape(B, 1)


def init_params(key):
    """torch.nn.Linear-style U(-1/sqrt(fan_in), +1/sqrt(fan_in)) init.

    Weights stored (out_features, in_features); biases (out_features, 1) to
    match the lane-dense (batch-on-lanes) kernel orientation."""
    dims = [(10, 6), (6, 4), (4, 1)]
    params = []
    for fan_in, fan_out in dims:
        key, kw, kb = jax.random.split(key, 3)
        bound = 1.0 / jnp.sqrt(fan_in)
        w = jax.random.uniform(kw, (fan_out, fan_in), jnp.float32, -bound, bound)
        b = jax.random.uniform(kb, (fan_out, 1), jnp.float32, -bound, bound)
        params += [w, b]
    return tuple(params)


def mlp_reference(x, params):
    """Plain-JAX reference (standard batch-major orientation)."""
    w1, b1, w2, b2, w3, b3 = params
    h = jnp.maximum(x @ w1.T + b1.T, 0.0)
    h = jnp.maximum(h @ w2.T + b2.T, 0.0)
    return jax.nn.sigmoid(h @ w3.T + b3.T)


if __name__ == "__main__":
    key = jax.random.PRNGKey(0)
    key, kx = jax.random.split(key)

    B = 8                       # small smoke-test batch
    x = jax.random.normal(kx, (B, 10), jnp.float32)
    params = init_params(key)

    ref = mlp_reference(x, params)

    # PyTorch-contract path: (B, 10) -> (B, 1)
    out = jax.block_until_ready(mlp_forward(x, params))
    assert out.shape == (B, 1)
    assert jnp.allclose(out, ref, atol=1e-5, rtol=1e-5)

    # Feature-major fast path: (10, B) -> (1, B)
    out_fm = jax.block_until_ready(mlp_forward_fm(x.T, params))
    assert out_fm.shape == (1, B)
    assert jnp.allclose(out_fm.T, ref, atol=1e-5, rtol=1e-5)

    print("KERNEL_OK")
</pallas_src>

<mosaic_0001>
module attributes {stable_mosaic.version = 11 : i64} {
  func.func @mlp_kernel(%arg0: i32, %arg1: memref<10x128xf32, #tpu.memory_space<vmem>>, %arg2: memref<6x10xf32, #tpu.memory_space<vmem>>, %arg3: memref<6x1xf32, #tpu.memory_space<vmem>>, %arg4: memref<4x6xf32, #tpu.memory_space<vmem>>, %arg5: memref<4x1xf32, #tpu.memory_space<vmem>>, %arg6: memref<1x4xf32, #tpu.memory_space<vmem>>, %arg7: memref<1x1xf32, #tpu.memory_space<vmem>>, %arg8: memref<1x128xf32, #tpu.memory_space<vmem>>) attributes {dimension_semantics = [#tpu.dimension_semantics<parallel>], iteration_bounds = array<i64: 1>, scalar_prefetch = 0 : i64, scratch_operands = 0 : i64, tpu.core_type = #tpu.core_type<tc>, window_params = [{transform_indices = @transform_0, window_bounds = array<i64: 10, 128>}, {pipeline_mode = #tpu.pipeline_mode<synchronous>, transform_indices = @transform_1, window_bounds = array<i64: 6, 10>}, {pipeline_mode = #tpu.pipeline_mode<synchronous>, transform_indices = @transform_2, window_bounds = array<i64: 6, 1>}, {pipeline_mode = #tpu.pipeline_mode<synchronous>, transform_indices = @transform_3, window_bounds = array<i64: 4, 6>}, {pipeline_mode = #tpu.pipeline_mode<synchronous>, transform_indices = @transform_4, window_bounds = array<i64: 4, 1>}, {pipeline_mode = #tpu.pipeline_mode<synchronous>, transform_indices = @transform_5, window_bounds = array<i64: 1, 4>}, {pipeline_mode = #tpu.pipeline_mode<synchronous>, transform_indices = @transform_6, window_bounds = array<i64: 1, 1>}, {transform_indices = @transform_7, window_bounds = array<i64: 1, 128>}]} {
    %c0 = arith.constant 0 : index
    %c0_0 = arith.constant 0 : index
    %0 = vector.load %arg1[%c0, %c0_0] : memref<10x128xf32, #tpu.memory_space<vmem>>, vector<10x128xf32>
    %c0_1 = arith.constant 0 : index
    %c0_2 = arith.constant 0 : index
    %1 = vector.load %arg2[%c0_1, %c0_2] : memref<6x10xf32, #tpu.memory_space<vmem>>, vector<6x10xf32>
    %cst = arith.constant dense<0.000000e+00> : vector<6x128xf32>
    %2 = tpu.matmul %1, %0, %cst {dimension_numbers = #tpu.dot_dimension_numbers<[1], [0], [0], [1], [0, 0, 1, 1], [], []>} : vector<6x10xf32>, vector<10x128xf32>, vector<6x128xf32> -> vector<6x128xf32>
    %c0_3 = arith.constant 0 : index
    %c0_4 = arith.constant 0 : index
    %3 = vector.load %arg3[%c0_3, %c0_4] : memref<6x1xf32, #tpu.memory_space<vmem>>, vector<6x1xf32>
    %4 = vector.broadcast %3 : vector<6x1xf32> to vector<6x128xf32>
    %5 = arith.addf %2, %4 : vector<6x128xf32>
    %cst_5 = arith.constant 0.000000e+00 : f32
    %6 = vector.broadcast %cst_5 : f32 to vector<6x128xf32>
    %7 = arith.maximumf %5, %6 : vector<6x128xf32>
    %c0_6 = arith.constant 0 : index
    %c0_7 = arith.constant 0 : index
    %8 = vector.load %arg4[%c0_6, %c0_7] : memref<4x6xf32, #tpu.memory_space<vmem>>, vector<4x6xf32>
    %cst_8 = arith.constant dense<0.000000e+00> : vector<4x128xf32>
    %9 = tpu.matmul %8, %7, %cst_8 {dimension_numbers = #tpu.dot_dimension_numbers<[1], [0], [0], [1], [0, 0, 1, 1], [], []>} : vector<4x6xf32>, vector<6x128xf32>, vector<4x128xf32> -> vector<4x128xf32>
    %c0_9 = arith.constant 0 : index
    %c0_10 = arith.constant 0 : index
    %10 = vector.load %arg5[%c0_9, %c0_10] : memref<4x1xf32, #tpu.memory_space<vmem>>, vector<4x1xf32>
    %11 = vector.broadcast %10 : vector<4x1xf32> to vector<4x128xf32>
    %12 = arith.addf %9, %11 : vector<4x128xf32>
    %cst_11 = arith.constant 0.000000e+00 : f32
    %13 = vector.broadcast %cst_11 : f32 to vector<4x128xf32>
    %14 = arith.maximumf %12, %13 : vector<4x128xf32>
    %c0_12 = arith.constant 0 : index
    %c0_13 = arith.constant 0 : index
    %15 = vector.load %arg6[%c0_12, %c0_13] : memref<1x4xf32, #tpu.memory_space<vmem>>, vector<1x4xf32>
    %cst_14 = arith.constant dense<0.000000e+00> : vector<1x128xf32>
    %16 = tpu.matmul %15, %14, %cst_14 {dimension_numbers = #tpu.dot_dimension_numbers<[1], [0], [0], [1], [0, 0, 1, 1], [], []>} : vector<1x4xf32>, vector<4x128xf32>, vector<1x128xf32> -> vector<1x128xf32>
    %c0_15 = arith.constant 0 : index
    %c0_16 = arith.constant 0 : index
    %17 = vector.load %arg7[%c0_15, %c0_16] : memref<1x1xf32, #tpu.memory_space<vmem>>, vector<1x1xf32>
    %18 = vector.broadcast %17 : vector<1x1xf32> to vector<1x128xf32>
    %19 = arith.addf %16, %18 : vector<1x128xf32>
    %20 = arith.negf %19 : vector<1x128xf32>
    %21 = math.exp %20 : vector<1x128xf32>
    %cst_17 = arith.constant 1.000000e+00 : f32
    %22 = vector.broadcast %cst_17 : f32 to vector<1x128xf32>
    %23 = arith.addf %22, %21 : vector<1x128xf32>
    %24 = arith.divf %22, %23 : vector<1x128xf32>
    %c0_18 = arith.constant 0 : index
    %c0_19 = arith.constant 0 : index
    %25 = vector.load %arg8[%c0_18, %c0_19] : memref<1x128xf32, #tpu.memory_space<vmem>>, vector<1x128xf32>
    tpu.vector_store %arg8[%c0_18, %c0_19], %24 {strides = array<i32>} : memref<1x128xf32, #tpu.memory_space<vmem>>, vector<1x128xf32>,
    return
  }
  func.func @transform_0(%arg0: i32) -> (i32, i32) {
    %c0_i32 = arith.constant 0 : i32
    %c0_i32_0 = arith.constant 0 : i32
    return %c0_i32, %arg0 : i32, i32
  }
  func.func @transform_1(%arg0: i32) -> (i32, i32) {
    %c0_i32 = arith.constant 0 : i32
    %c0_i32_0 = arith.constant 0 : i32
    %c0_i32_1 = arith.constant 0 : i32
    return %c0_i32, %c0_i32_0 : i32, i32
  }
  func.func @transform_2(%arg0: i32) -> (i32, i32) {
    %c0_i32 = arith.constant 0 : i32
    %c0_i32_0 = arith.constant 0 : i32
    %c0_i32_1 = arith.constant 0 : i32
    return %c0_i32, %c0_i32_0 : i32, i32
  }
  func.func @transform_3(%arg0: i32) -> (i32, i32) {
    %c0_i32 = arith.constant 0 : i32
    %c0_i32_0 = arith.constant 0 : i32
    %c0_i32_1 = arith.constant 0 : i32
    return %c0_i32, %c0_i32_0 : i32, i32
  }
  func.func @transform_4(%arg0: i32) -> (i32, i32) {
    %c0_i32 = arith.constant 0 : i32
    %c0_i32_0 = arith.constant 0 : i32
    %c0_i32_1 = arith.constant 0 : i32
    return %c0_i32, %c0_i32_0 : i32, i32
  }
  func.func @transform_5(%arg0: i32) -> (i32, i32) {
    %c0_i32 = arith.constant 0 : i32
    %c0_i32_0 = arith.constant 0 : i32
    %c0_i32_1 = arith.constant 0 : i32
    return %c0_i32, %c0_i32_0 : i32, i32
  }
  func.func @transform_6(%arg0: i32) -> (i32, i32) {
    %c0_i32 = arith.constant 0 : i32
    %c0_i32_0 = arith.constant 0 : i32
    %c0_i32_1 = arith.constant 0 : i32
    return %c0_i32, %c0_i32_0 : i32, i32
  }
  func.func @transform_7(%arg0: i32) -> (i32, i32) {
    %c0_i32 = arith.constant 0 : i32
    %c0_i32_0 = arith.constant 0 : i32
    return %c0_i32, %arg0 : i32, i32
  }
}

</mosaic_0001>

<bundles_post_ra>
// kernel: tpu_custom_call.1
= control target key start
LH: loop header
LB: loop body
LE: loop exit
PB: predicated region body
PF: predicated region fallthrough
CT: control target
= control target key end

     0   :  { %s487_s0 = inlined_call_operand.vmem [shape: f32[10,128], index: 0, kind: input, shape index: {}]   ;;  %s488_s1 = inlined_call_operand.hbm [shape: f32[6,10], index: 1, kind: input, shape index: {}]   ;;  %s489_s2 = inlined_call_operand.vmem [shape: f32[6,1], index: 2, kind: input, shape index: {}]   ;;  %s490_s3 = inlined_call_operand.vmem [shape: f32[4,6], index: 3, kind: input, shape index: {}]   ;;  %s491_s4 = inlined_call_operand.vmem [shape: f32[4,1], index: 4, kind: input, shape index: {}]   ;;  %s492_s5 = inlined_call_operand.vmem [shape: f32[1,4], index: 5, kind: input, shape index: {}]   ;;  %s493_s6 = inlined_call_operand.<no memory space> [shape: f32[1,1], index: 6, kind: input, shape index: {}]   ;;  %s494_s7 = inlined_call_operand.hbm [shape: f32[1,128], index: 7, kind: output, shape index: {}]  }
   0x1   :  { %v12_v0 = vstv %s493_s6 }
   0x2   :  { %13 = vst [vmem:[#allocation2] sm:$0x1] %v12_v0 }
   0x3   :  { %14 = vsyncpa [#allocation4], 0 }
   0x4   :  { %15 = vsyncpa [#allocation5], 0  ;;  %s412_s26 = smov [#allocation3]  }
   0x5   :  { %s24_s27 = sshll.u32 %s412_s26, 4  ;;  %s25_s27 = int_to_ptr.vmem [resolvable:$true] %s24_s27 }
   0x6   :  { %s376_s28 = scalar_lea.vmem %s25_s27, 128  ;;  %p381_p1 = scmp.lt.s32.totalorder %s25_s27, %s25_s27 }
   0x7   :  { %p377_p0 = scmp.ne.s32.totalorder %s25_s27, %s376_s28  ;;  %p382_p2 = scmp.lt.s32.totalorder %s376_s28, %s376_s28 }
   0x9   :  { %p383_p3 = por %p382_p2, %p381_p1 }
   0xb   :  { %p384_p4 = pnand %p383_p3, %p377_p0 }
   0xd   :  { %387 = shalt.err (!%p384_p4)
}
   0xe   :  { %27 = dma.hbm_to_vmem [thread:$0]  %s488_s1, 128, %s25_s27, [#allocation4]  }
   0xf   :  { %408 = dma.done.wait [#allocation4], 128  }
  0x10   :  { %409 = vsyncadd [#allocation4], 4294967168  ;;  %v413_v1 = vmov 0.0   ;;  %vm414_vm0 = vmmov 0   ;;  %v415_v2 = vmov 0   ;;  %vm54_vm1 = vcmask 1041408  }
  0x11   :  { %340 = vmatprep.subr.mxu0 %v413_v1  ;;  %344 = vmatprep.mubr.msk.f32.mxu0 %vm414_vm0, %v413_v1  ;;  %v42_v3 = vld [vmem:[%s487_s0 + $0x8] sm:$0x3]  ;;  %v41_v4 = vld [vmem:[%s487_s0] sm:$0xff]  ;;  %vm50_vm2 = vcmask 80896   ;;  %vm140_vm3 = vcmask 1045504   ;;  %vm136_vm4 = vcmask 48128   ;;  %v222_v21 = vlaneseq }
  0x12   :  { %362 = vset.pattern.permute.xlu0 %v415_v2  ;;  %347 = vmatprep.subr.mxu1 %v413_v1  ;;  %v43_v5 = vld [vmem:[#allocation3] sm:$0x3f]  ;;  %v216_v14 = vld [vmem:[#allocation2] sm:$0x1]  ;;  %vm230_vm5 = vcmask 1043456   ;;  %vm226_vm6 = vcmask 31744  }
  0x13   :  { %349 = vmatprep.mubr.msk.f32.mxu1 %vm414_vm0, %v413_v1  ;;  %363 = vset.pattern.permute.xlu1 %v415_v2  ;;  %v44_v6 = vld [vmem:[%s489_s2] sm:$0x3f]  ;;  %v223_v22 = vshrl.u32 %v222_v21, 7 }
  0x14   :  { %341 = vmatpush3.msk.msra.mxu0 %vm54_vm1, %v42_v3  ;;  %47 = vperm.xlu0 %362, %v44_v6   ;;  %v130_v7 = vld [vmem:[%s491_s4] sm:$0xf] }
  0x15   :  { %342 = vmatprep.subr.mxu0 %v413_v1  ;;  %v129_v13 = vld [vmem:[%s490_s3] sm:$0xf]  ;;  %219 = vperm.xlu1 %363, %v216_v14   ;;  %v224_v23 = vsub.s32 0, %v223_v22  ;;  %s416_s3 = smov [#allocation6]  }
  0x16   :  { %343 = vmatpush3.msra.mxu0 %v41_v4  ;;  %v215_v20 = vld [vmem:[%s492_s5] sm:$0x1]  ;;  %s317_s15 = sshll.u32 %s416_s3, 4  ;;  %s318_s15 = int_to_ptr.vmem [resolvable:$true] %s317_s15 }
  0x17   :  { %345 = vmatmul.mubr.msk.f32.vlgmr.msra.gmra.mxu0 %vm50_vm2, %v43_v5  ;;  %s388_s5 = scalar_lea.vmem %s318_s15, 16  ;;  %s392_s16 = scalar_lea.vmem %s318_s15, 32 }
  0x18   :  { %133 = vperm.xlu0 %362, %v130_v7   ;;  %p389_p5 = scmp.ne.s32.totalorder %s318_s15, %s388_s5  ;;  %p393_p6 = scmp.lt.s32.totalorder %s318_s15, %s318_s15 }
  0x19   :  { %p394_p7 = scmp.lt.s32.totalorder %s392_s16, %s388_s5 }
  0x1b   :  { %p395_p8 = por %p394_p7, %p393_p6 }
  0x1d   :  { %p396_p9 = pnand %p395_p8, %p389_p5 }
  0x8f   :  { %v48_v8 = vpop.permute.xlu0 %47 }
  0x90   :  { %v220_v24 = vpop.permute.xlu1 %219 }
  0x91   :  { %v225_v25 = vrot.slane %v220_v24, %v224_v23 }
  0x93   :  { %v134_v15 = vpop.permute.xlu0 %133 }
  0xd7   :  { %v124_v9 = vpop.f32.mrf.mxu0 }
  0xd8   :  { %v125_v10 = vadd.f32 %v124_v9, %v48_v8 }
  0xd9   :  { %v346_v11 = vpop.f32.mrf.mxu0 }
  0xda   :  { %v128_v12 = vmax.f32 %v125_v10, 0.0 }
  0xdc   :  { %348 = vmatpush3.msk.msra.mxu1 %vm140_vm3, %v128_v12 }
  0xdd   :  { %350 = vmatmul.mubr.msk.f32.vlgmr.msra.gmra.mxu1 %vm136_vm4, %v129_v13  ;;  %352 = vmatprep.subr.mxu1 %v413_v1 }
  0xde   :  { %354 = vmatprep.mubr.msk.f32.mxu1 %vm414_vm0, %v413_v1 }
 0x19d   :  { %v210_v16 = vpop.f32.mrf.mxu1 }
 0x19e   :  { %v211_v17 = vadd.f32 %v210_v16, %v134_v15 }
 0x19f   :  { %v351_v18 = vpop.f32.mrf.mxu1 }
 0x1a0   :  { %v214_v19 = vmax.f32 %v211_v17, 0.0 }
 0x1a2   :  { %353 = vmatpush3.msk.msra.mxu1 %vm230_vm5, %v214_v19 }
 0x1a3   :  { %355 = vmatmul.mubr.msk.f32.vlgmr.msra.gmra.mxu1 %vm226_vm6, %v215_v20 }
 0x263   :  { %v300_v26 = vpop.f32.mrf.mxu1 }
 0x264   :  { %v301_v27 = vadd.f32 %v300_v26, %v225_v25 }
 0x265   :  { %v356_v28 = vpop.f32.mrf.mxu1 }
 0x266   :  { %v332_v29 = vmul.f32 -1.442695, %v301_v27 }
 0x268   :  { %364 = vpow2.f32 %v332_v29 }
 0x275   :  { %v365_v30 = vpop.eup %364 }
 0x276   :  { %v307_v31 = vadd.f32 1.0, %v365_v30 }
 0x278   :  { %366 = vrcp.f32 %v307_v31 }
 0x285   :  { %v367_v32 = vpop.eup %366 }
 0x286   :  { %310 = vst [vmem:[#allocation6] sm:$0x1] %v367_v32 }
 0x287   :  { %399 = shalt.err (!%p396_p9)
}
 0x288   :  { %320 = dma.vmem_to_hbm [thread:$0]  %s318_s15, 16, %s494_s7, [#allocation5]  }
 0x289   :  { %410 = dma.done.wait [#allocation5], 16  }
 0x28a   :  { %411 = vsyncadd [#allocation5], 4294967280 }
 0x28b   :  { %324 = vsyncpa [#allocation4], 1 }
 0x28c   :  { %325 = vsyncpa [#allocation5], 1 }

</bundles_post_ra>
